<compile_context>
chip_gen: v7x
topology: tpu7x:2x2x1
jax: 0.10.0
libtpu: 0.0.40
codegen_flags: <defaults>
</compile_context>

<pallas_src>
import math

import jax
import jax.numpy as jnp
from jax.experimental import pallas as pl
from jax.experimental.pallas import tpu as pltpu

_INV_SQRT2 = 0.7071067811865476  # 1/sqrt(2), hoisted constant


def _gelu_exact(x):
    # nn.GELU() default is the exact (erf-based) GELU; keep erf for parity with PyTorch.
    return 0.5 * x * (1.0 + jax.lax.erf(x * _INV_SQRT2))


def prediction_head_kernel(x_ref, w1_ref, b1_ref, w2_ref, b2_ref, w3r_ref, b3_ref, o_ref):
    # x_ref: [tile_b, in] f32 -> cast to bf16 here (no extra HBM cast/pad pass in the wrapper).
    x = x_ref[...].astype(jnp.bfloat16)

    # Layer 1: Linear(input_dim -> hidden) + GELU  (MXU bf16 x bf16, f32 accumulation)
    h1 = jnp.dot(x, w1_ref[...], preferred_element_type=jnp.float32) + b1_ref[...]
    h1 = _gelu_exact(h1)
    # Dropout -> identity (eval mode)

    # Layer 2: Linear(hidden -> hidden//2) + GELU
    h2 = jnp.dot(h1.astype(jnp.bfloat16), w2_ref[...],
                 preferred_element_type=jnp.float32) + b2_ref[...]
    h2 = _gelu_exact(h2)
    # Dropout -> identity (eval mode)

    # Layer 3: Linear(hidden//2 -> 1). Contract the weight row against h2's feature axis
    # (same structure as a q @ k^T score matmul) so the per-row scalars land lane-dense
    # as a [1, tile_b] slab -> full-lane stores instead of 1-lane vst.msk partial stores.
    out_row = jnp.einsum("oh,bh->ob", w3r_ref[...], h2,
                         preferred_element_type=jnp.float32)        # [1, tile_b]
    o_ref[...] = (out_row + b3_ref[0])[None].astype(o_ref.dtype)    # [1, 1, tile_b]


def _round_up(x, m):
    return ((x + m - 1) // m) * m


def _pick_tile_b(B, tile_b):
    tile_b = min(tile_b, _round_up(B, 8))
    tile_b = max(8, (tile_b // 8) * 8)
    # Keep >= 4 grid steps when the batch allows it so a v7x megacore ("parallel" batch
    # axis) has work for both TensorCores. No-op on single-TC v5e/v6e.
    while tile_b > 8 and pl.cdiv(B, tile_b) < 4:
        tile_b = max(8, ((tile_b // 2) // 8) * 8)
    return tile_b


def prediction_head_forward(features, params, *, tile_b=1024):
    """features: [B, input_dim] float32. Returns [B] float32 (binding energy)."""
    w1, b1, w2, b2, w3, b3 = params
    B, input_dim = features.shape
    hidden = w1.shape[1]
    h2dim = w2.shape[1]

    tile_b = _pick_tile_b(B, tile_b)
    num_tiles = pl.cdiv(B, tile_b)   # ragged trailing block handled by Pallas; padded
                                     # rows never touch valid rows and are sliced off below.

    # One-time tiny bf16 casts for the weights (DMA'd once via constant-index BlockSpecs).
    w1_bf = w1.astype(jnp.bfloat16)
    w2_bf = w2.astype(jnp.bfloat16)
    b1_row = b1.reshape(1, hidden).astype(jnp.float32)
    b2_row = b2.reshape(1, h2dim).astype(jnp.float32)
    w3_row = w3.reshape(1, h2dim).astype(jnp.float32)
    b3_s = b3.reshape(1).astype(jnp.float32)          # scalar bias -> SMEM

    # Explicit scoped-VMEM budget: double-buffered feature/output tiles + resident weights
    # + f32 intermediates, with 2x headroom, clamped to a v7x-safe 64 MiB.
    est = (2 * tile_b * input_dim * 4                              # f32 feature tiles (x2 buffers)
           + 2 * tile_b * 4                                        # f32 output rows (x2 buffers)
           + 2 * 2 * (input_dim * hidden + hidden * h2dim)         # bf16 weights
           + 4 * 2 * (hidden + 2 * h2dim)                          # bias / w3 rows
           + tile_b * (hidden + h2dim) * 6)                        # f32 h1/h2 + bf16 copies
    vmem_limit = int(min(max(2 * est, 32 << 20), 64 << 20))

    cost = pl.CostEstimate(
        flops=2 * B * (input_dim * hidden + hidden * h2dim + h2dim),
        transcendentals=B * (hidden + h2dim),
        bytes_accessed=(B * input_dim * 4                            # f32 feature stream
                        + (input_dim * hidden + hidden * h2dim) * 2  # bf16 weights
                        + (hidden + 3 * h2dim + 1) * 4               # biases + w3 row
                        + num_tiles * tile_b * 4),                   # f32 output
    )

    out = pl.pallas_call(
        prediction_head_kernel,
        out_shape=jax.ShapeDtypeStruct((num_tiles, 1, tile_b), jnp.float32),
        grid=(num_tiles,),
        in_specs=[
            pl.BlockSpec((tile_b, input_dim), lambda i: (i, 0)),     # features: tiled over batch
            # Constant-index -> DMA'd once, VMEM-resident across the whole grid.
            # TODO(synk): single-buffer these (pipeline_mode=pl.Buffered(1)) once confirmed on
            # this jax build; halves resident weight VMEM, which matters on v7x's 64 MiB.
            pl.BlockSpec((input_dim, hidden), lambda i: (0, 0)),     # w1
            pl.BlockSpec((1, hidden), lambda i: (0, 0)),             # b1
            pl.BlockSpec((hidden, h2dim), lambda i: (0, 0)),         # w2
            pl.BlockSpec((1, h2dim), lambda i: (0, 0)),              # b2
            pl.BlockSpec((1, h2dim), lambda i: (0, 0)),              # w3 (as a row)
            pl.BlockSpec(memory_space=pltpu.MemorySpace.SMEM),       # b3 scalar in SMEM
        ],
        out_specs=pl.BlockSpec((1, 1, tile_b), lambda i: (i, 0, 0)),  # lane-dense output
        compiler_params=pltpu.CompilerParams(
            dimension_semantics=("parallel",),                        # megacore sharding on v7x
            vmem_limit_bytes=vmem_limit,
        ),
        cost_estimate=cost,
    )(features, w1_bf, b1_row, w2_bf, b2_row, w3_row, b3_s)

    # squeeze(-1) + drop ragged-tile padding — glue, done outside the kernel.
    return out.reshape(-1)[:B]


def init_params(key, input_dim, hidden_dim):
    """Deterministic PyTorch-style uniform init (kaiming-uniform bound = 1/sqrt(fan_in))."""
    h2 = hidden_dim // 2
    keys = jax.random.split(key, 6)

    def linear(kw, kb, fan_in, fan_out):
        bound = 1.0 / math.sqrt(fan_in)
        w = jax.random.uniform(kw, (fan_in, fan_out), jnp.float32, -bound, bound)
        b = jax.random.uniform(kb, (1, fan_out), jnp.float32, -bound, bound)
        return w, b

    w1, b1 = linear(keys[0], keys[1], input_dim, hidden_dim)
    w2, b2 = linear(keys[2], keys[3], hidden_dim, h2)
    w3, b3 = linear(keys[4], keys[5], h2, 1)
    return (w1, b1, w2, b2, w3, b3)


def reference_forward(features, params):
    """Pure-JAX reference mirroring the kernel's bf16-stream / f32-accumulate numerics.

    NOTE: this intentionally matches the kernel's reduced precision. For production dims,
    also validate against a true f32 reference with an appropriate tolerance.
    """
    w1, b1, w2, b2, w3, b3 = params
    xb = features.astype(jnp.bfloat16)
    h1 = _gelu_exact(jnp.dot(xb, w1.astype(jnp.bfloat16),
                             preferred_element_type=jnp.float32) + b1.reshape(1, -1))
    h2 = _gelu_exact(jnp.dot(h1.astype(jnp.bfloat16), w2.astype(jnp.bfloat16),
                             preferred_element_type=jnp.float32) + b2.reshape(1, -1))
    out = jnp.einsum("oh,bh->ob", w3.reshape(1, -1), h2,
                     preferred_element_type=jnp.float32)[0] + b3.reshape(())
    return out


if __name__ == "__main__":
    key = jax.random.PRNGKey(0)
    k_in, k_params = jax.random.split(key)

    batch = 64
    input_dim = 32
    hidden_dim = 64   # hidden_dim // 2 == 32

    features = jax.random.normal(k_in, (batch, input_dim), jnp.float32)
    params = init_params(k_params, input_dim, hidden_dim)

    # Default tile_b auto-shrinks to 16 here -> a 4-step batch grid is exercised.
    out = jax.block_until_ready(prediction_head_forward(features, params))
    ref = reference_forward(features, params)

    assert out.shape == (batch,), out.shape
    assert jnp.allclose(out, ref, atol=2e-3, rtol=2e-3), (out, ref)

    print("KERNEL_OK")
</pallas_src>

<mosaic_0001>
module attributes {stable_mosaic.version = 11 : i64} {
  func.func @prediction_head_kernel(%arg0: i32, %arg1: memref<16x32xf32, #tpu.memory_space<vmem>>, %arg2: memref<32x64xbf16, #tpu.memory_space<vmem>>, %arg3: memref<1x64xf32, #tpu.memory_space<vmem>>, %arg4: memref<64x32xbf16, #tpu.memory_space<vmem>>, %arg5: memref<1x32xf32, #tpu.memory_space<vmem>>, %arg6: memref<1x32xf32, #tpu.memory_space<vmem>>, %arg7: memref<1xf32, #tpu.memory_space<smem>>, %arg8: memref<1x1x16xf32, #tpu.memory_space<vmem>>) attributes {dimension_semantics = [#tpu.dimension_semantics<parallel>], iteration_bounds = array<i64: 4>, scalar_prefetch = 0 : i64, scratch_operands = 0 : i64, tpu.core_type = #tpu.core_type<tc>, window_params = [{transform_indices = @transform_0, window_bounds = array<i64: 16, 32>}, {pipeline_mode = #tpu.pipeline_mode<synchronous>, transform_indices = @transform_1, window_bounds = array<i64: 32, 64>}, {pipeline_mode = #tpu.pipeline_mode<synchronous>, transform_indices = @transform_2, window_bounds = array<i64: 1, 64>}, {pipeline_mode = #tpu.pipeline_mode<synchronous>, transform_indices = @transform_3, window_bounds = array<i64: 64, 32>}, {pipeline_mode = #tpu.pipeline_mode<synchronous>, transform_indices = @transform_4, window_bounds = array<i64: 1, 32>}, {pipeline_mode = #tpu.pipeline_mode<synchronous>, transform_indices = @transform_5, window_bounds = array<i64: 1, 32>}, {transform_indices = @transform_6, window_bounds = array<i64: 1>}, {transform_indices = @transform_7, window_bounds = array<i64: 1, 1, 16>}]} {
    %c0 = arith.constant 0 : index
    %c0_0 = arith.constant 0 : index
    %0 = vector.load %arg1[%c0, %c0_0] : memref<16x32xf32, #tpu.memory_space<vmem>>, vector<16x32xf32>
    %1 = arith.truncf %0 : vector<16x32xf32> to vector<16x32xbf16>
    %c0_1 = arith.constant 0 : index
    %c0_2 = arith.constant 0 : index
    %2 = vector.load %arg2[%c0_1, %c0_2] : memref<32x64xbf16, #tpu.memory_space<vmem>>, vector<32x64xbf16>
    %cst = arith.constant dense<0.000000e+00> : vector<16x64xf32>
    %3 = tpu.matmul %1, %2, %cst {dimension_numbers = #tpu.dot_dimension_numbers<[1], [0], [0], [1], [0, 0, 1, 1], [], []>} : vector<16x32xbf16>, vector<32x64xbf16>, vector<16x64xf32> -> vector<16x64xf32>
    %c0_3 = arith.constant 0 : index
    %c0_4 = arith.constant 0 : index
    %4 = vector.load %arg3[%c0_3, %c0_4] : memref<1x64xf32, #tpu.memory_space<vmem>>, vector<1x64xf32>
    %5 = vector.broadcast %4 : vector<1x64xf32> to vector<16x64xf32>
    %6 = arith.addf %3, %5 : vector<16x64xf32>
    %cst_5 = arith.constant 5.000000e-01 : f32
    %7 = vector.broadcast %cst_5 : f32 to vector<16x64xf32>
    %8 = arith.mulf %7, %6 : vector<16x64xf32>
    %cst_6 = arith.constant 0.707106769 : f32
    %9 = vector.broadcast %cst_6 : f32 to vector<16x64xf32>
    %10 = arith.mulf %6, %9 : vector<16x64xf32>
    %11 = math.erf %10 : vector<16x64xf32>
    %cst_7 = arith.constant 1.000000e+00 : f32
    %12 = vector.broadcast %cst_7 : f32 to vector<16x64xf32>
    %13 = arith.addf %12, %11 : vector<16x64xf32>
    %14 = arith.mulf %8, %13 : vector<16x64xf32>
    %15 = arith.truncf %14 : vector<16x64xf32> to vector<16x64xbf16>
    %c0_8 = arith.constant 0 : index
    %c0_9 = arith.constant 0 : index
    %16 = vector.load %arg4[%c0_8, %c0_9] : memref<64x32xbf16, #tpu.memory_space<vmem>>, vector<64x32xbf16>
    %cst_10 = arith.constant dense<0.000000e+00> : vector<16x32xf32>
    %17 = tpu.matmul %15, %16, %cst_10 {dimension_numbers = #tpu.dot_dimension_numbers<[1], [0], [0], [1], [0, 0, 1, 1], [], []>} : vector<16x64xbf16>, vector<64x32xbf16>, vector<16x32xf32> -> vector<16x32xf32>
    %c0_11 = arith.constant 0 : index
    %c0_12 = arith.constant 0 : index
    %18 = vector.load %arg5[%c0_11, %c0_12] : memref<1x32xf32, #tpu.memory_space<vmem>>, vector<1x32xf32>
    %19 = vector.broadcast %18 : vector<1x32xf32> to vector<16x32xf32>
    %20 = arith.addf %17, %19 : vector<16x32xf32>
    %cst_13 = arith.constant 5.000000e-01 : f32
    %21 = vector.broadcast %cst_13 : f32 to vector<16x32xf32>
    %22 = arith.mulf %21, %20 : vector<16x32xf32>
    %cst_14 = arith.constant 0.707106769 : f32
    %23 = vector.broadcast %cst_14 : f32 to vector<16x32xf32>
    %24 = arith.mulf %20, %23 : vector<16x32xf32>
    %25 = math.erf %24 : vector<16x32xf32>
    %cst_15 = arith.constant 1.000000e+00 : f32
    %26 = vector.broadcast %cst_15 : f32 to vector<16x32xf32>
    %27 = arith.addf %26, %25 : vector<16x32xf32>
    %28 = arith.mulf %22, %27 : vector<16x32xf32>
    %c0_16 = arith.constant 0 : index
    %c0_17 = arith.constant 0 : index
    %29 = vector.load %arg6[%c0_16, %c0_17] : memref<1x32xf32, #tpu.memory_space<vmem>>, vector<1x32xf32>
    "tpu.trace_start"() <{level = 10 : i32, message = "oh,bh->ob"}> : () -> ()
    %cst_18 = arith.constant dense<0.000000e+00> : vector<1x16xf32>
    %30 = tpu.matmul %29, %28, %cst_18 {dimension_numbers = #tpu.dot_dimension_numbers<[1], [1], [0], [0], [0, 0, 1, 0], [], []>} : vector<1x32xf32>, vector<16x32xf32>, vector<1x16xf32> -> vector<1x16xf32>
    "tpu.trace_stop"() : () -> ()
    %c0_19 = arith.constant 0 : index
    %31 = memref.load %arg7[%c0_19] : memref<1xf32, #tpu.memory_space<smem>>
    %32 = vector.broadcast %31 : f32 to vector<1x16xf32>
    %33 = arith.addf %30, %32 : vector<1x16xf32>
    %34 = vector.shape_cast %33 : vector<1x16xf32> to vector<1x1x16xf32>
    %c0_20 = arith.constant 0 : index
    %c0_21 = arith.constant 0 : index
    %c0_22 = arith.constant 0 : index
    %35 = vector.load %arg8[%c0_20, %c0_21, %c0_22] : memref<1x1x16xf32, #tpu.memory_space<vmem>>, vector<1x1x16xf32>
    tpu.vector_store %arg8[%c0_20, %c0_21, %c0_22], %34 {strides = array<i32>} : memref<1x1x16xf32, #tpu.memory_space<vmem>>, vector<1x1x16xf32>,
    return
  }
  func.func @transform_0(%arg0: i32) -> (i32, i32) {
    %c0_i32 = arith.constant 0 : i32
    %c0_i32_0 = arith.constant 0 : i32
    return %arg0, %c0_i32 : i32, i32
  }
  func.func @transform_1(%arg0: i32) -> (i32, i32) {
    %c0_i32 = arith.constant 0 : i32
    %c0_i32_0 = arith.constant 0 : i32
    %c0_i32_1 = arith.constant 0 : i32
    return %c0_i32, %c0_i32_0 : i32, i32
  }
  func.func @transform_2(%arg0: i32) -> (i32, i32) {
    %c0_i32 = arith.constant 0 : i32
    %c0_i32_0 = arith.constant 0 : i32
    %c0_i32_1 = arith.constant 0 : i32
    return %c0_i32, %c0_i32_0 : i32, i32
  }
  func.func @transform_3(%arg0: i32) -> (i32, i32) {
    %c0_i32 = arith.constant 0 : i32
    %c0_i32_0 = arith.constant 0 : i32
    %c0_i32_1 = arith.constant 0 : i32
    return %c0_i32, %c0_i32_0 : i32, i32
  }
  func.func @transform_4(%arg0: i32) -> (i32, i32) {
    %c0_i32 = arith.constant 0 : i32
    %c0_i32_0 = arith.constant 0 : i32
    %c0_i32_1 = arith.constant 0 : i32
    return %c0_i32, %c0_i32_0 : i32, i32
  }
  func.func @transform_5(%arg0: i32) -> (i32, i32) {
    %c0_i32 = arith.constant 0 : i32
    %c0_i32_0 = arith.constant 0 : i32
    %c0_i32_1 = arith.constant 0 : i32
    return %c0_i32, %c0_i32_0 : i32, i32
  }
  func.func @transform_6(%arg0: i32) -> i32 {
    %c0_i32 = arith.constant 0 : i32
    %c0_i32_0 = arith.constant 0 : i32
    return %c0_i32 : i32
  }
  func.func @transform_7(%arg0: i32) -> (i32, i32, i32) {
    %c0_i32 = arith.constant 0 : i32
    %c0_i32_0 = arith.constant 0 : i32
    %c0_i32_1 = arith.constant 0 : i32
    return %arg0, %c0_i32, %c0_i32_0 : i32, i32, i32
  }
}

</mosaic_0001>

<bundles_post_ra>
// kernel: tpu_custom_call.1
= control target key start
LH: loop header
LB: loop body
LE: loop exit
PB: predicated region body
PF: predicated region fallthrough
CT: control target
= control target key end

     0   :  { %s969_s0 = inlined_call_operand.vmem [shape: f32[64,32], index: 0, kind: input, shape index: {}]   ;;  %s970_s1 = inlined_call_operand.vmem [shape: bf16[32,64], index: 1, kind: input, shape index: {}]   ;;  %s971_s2 = inlined_call_operand.vmem [shape: f32[1,64], index: 2, kind: input, shape index: {}]   ;;  %s972_s3 = inlined_call_operand.vmem [shape: bf16[64,32], index: 3, kind: input, shape index: {}]   ;;  %s973_s4 = inlined_call_operand.vmem [shape: f32[1,32], index: 4, kind: input, shape index: {}]   ;;  %s974_s5 = inlined_call_operand.vmem [shape: f32[1,32], index: 5, kind: input, shape index: {}]   ;;  %s975_s6 = inlined_call_operand.<no memory space> [shape: f32[1], index: 6, kind: input, shape index: {}]   ;;  %s976_s7 = inlined_call_operand.hbm [shape: f32[4,1,16], index: 7, kind: output, shape index: {}]  }
   0x1   :  { %12 = sst [smem:[#allocation2]] %s975_s6 }
   0x2   :  { %13 = vsyncpa [#allocation4], 0 }
   0x3   :  { %15 = vsyncpa [#allocation4 + $0x1], 0  ;;  %s839_s26 = smov 0   ;;  %s841_s27 = smov 0  }
   0x4   :  { %s843_s28 = smov 0   ;;  %s845_s29 = smov 0  }
   0x5 LB: > { %s860_s6 = sadd.s32 4294967295, %s790_s29   ;;  %s608_s30 = sadd.s32 4294967294, %s790_s29   ;;  %s790_s29 = sphi %s845_s29, %s982_s29   ;;  %s786_s28 = sphi %s843_s28, %s981_s28   ;;  %s782_s27 = sphi %s841_s27, %s980_s27   ;;  %s778_s26 = sphi %s839_s26, %s979_s26  }
   0x6   : > { %s864_s8 = sadd.s32 1, %s790_s29   ;;  %s180_s9 = sadd.s32 1, %s786_s28 }
   0x7   : > { %s177_s10 = ssub.s32 %s790_s29, %s864_s8  ;;  %p190_p0 = scmp.ne.s32.totalorder %s786_s28, %s782_s27 }
   0x8   : > { %p178_p1 = scmp.eq.s32.totalorder %s177_s10, 0  ;;  %p191_p2 = scmp.eq.s32.totalorder %s860_s6, 3 }
   0x9   : > { %p196_p3 = scmp.ne.s32.totalorder %s782_s27, %s778_s26  ;;  %p197_p4 = scmp.eq.s32.totalorder %s608_s30, 3 }
   0xa   : > { %s875_s11 = scalar_select %p178_p1, %s786_s28, %s180_s9  }
   0xb   : > { %p877_p5 = por %p191_p2, %p190_p0  ;;  %p881_p6 = por %p197_p4, %p196_p3 }
   0xc   : > { %p611_p7 = scmp.ge.s32.totalorder %s790_s29, 1  ;;  %p242_p8 = scmp.lt.s32.totalorder %s790_s29, 5 }
   0xe   : > { %p243_p9 = pnand %p611_p7, %p242_p8 }
   0xf   : > { %v714_v0 = vld [vmem:[%s970_s1] sm:$0xff] (!%p243_p9)   ;;  %v792_v1 = vmov (!%p243_p9), 0.0   ;;  %v715_v2 = vld [vmem:[%s970_s1 + $0x8] sm:$0xff] (!%p243_p9)   ;;  %vm793_vm0 = vmmov (!%p243_p9), 0   ;;  %s612_s18 = sshll.u32 (!%p243_p9), %s860_s6, 1  ;;  %vm306_vm1 = vcmask (!%p243_p9), 261120  }
  0x10   : > { %246 = sbr.rel (%p243_p9) target bundleno = 734 (0x2de), region = 48  ;;  %641 = vmatprep.subr.bf16.mxu0 (!%p243_p9), %v792_v1  ;;  %649 = vmatprep.subr.bf16.mxu1 (!%p243_p9), %v792_v1  ;;  %p274_p10 = scmp.lt.s32.totalorder (!%p243_p9), %s612_s18, 7  ;;  %v716_v6 = vld [vmem:[%s972_s3] sm:$0xff] (!%p243_p9)   ;;  %v717_v7 = vld [vmem:[%s972_s3 + $0x8] sm:$0xff] (!%p243_p9)   ;;  %v718_v8 = vld [vmem:[%s972_s3 + $0x10] sm:$0xff] (!%p243_p9)   ;;  %vm401_vm2 = vcmask (!%p243_p9), 523264  }
  0x11   : > { %642 = vmatpush3.bf16.msra.mxu0 (!%p243_p9), %v714_v0  ;;  %645 = vmatprep.mubr.msk.bf16.mxu0 (!%p243_p9), %vm793_vm0, %v792_v1  ;;  %v719_v9 = vld [vmem:[%s972_s3 + $0x18] sm:$0xff] (!%p243_p9)   ;;  %v614_v10 = vld [vmem:[%s971_s2] ss:$0 sm:$0xff] (!%p243_p9)  ;;  %v794_v28 = vmov (!%p243_p9), 0.0|0.0   ;;  %vm670_vm3 = vmpackc.low (!%p243_p9), %vm306_vm1, %vm306_vm1  ;;  %s271_s23 = sand.u32 (!%p243_p9), 1, %s782_s27   ;;  %s627_s24 = sshll.u32 (!%p243_p9), %s860_s6, 4 }
  0x12   : > { %643 = vmatprep.subr.bf16.mxu0 (!%p243_p9), %v792_v1  ;;  %657 = vmatprep.mubr.msk.bf16.mxu1 (!%p243_p9), %vm793_vm0, %v792_v1  ;;  %v618_v29 = vld [vmem:[%s973_s4] ss:$0 sm:$0xff] (!%p243_p9)  ;;  %s272_s25 = scalar_lea.vmem (!%p243_p9), [#allocation3], %s271_s23  ;;  %vm538_vm4 = vcmask (!%p243_p9), 122880   ;;  %s927_s14 = scalar_lea.hbm (!%p243_p9), %s976_s7, %s627_s24 }
  0x13   : > { %650 = vmatpush3.bf16.msra.mxu1 (!%p243_p9), %v716_v6  ;;  %v456_v47 = vld [vmem:[%s974_s5] sm:$0x1] (!%p243_p9)  ;;  %s553_s30 = sshll.u32 (!%p243_p9), %s272_s25, 4  ;;  %s541_s15 = scalar_lea.sflag (!%p243_p9), [#allocation4], %s271_s23  ;;  %s929_s30 = int_to_ptr.vmem [resolvable:$true] %s553_s30 }
  0x14   : > { %651 = vmatprep.subr.bf16.mxu1 (!%p243_p9), %v792_v1  ;;  %s728_s16 = scalar_lea.vmem (!%p243_p9), %s929_s30, 16  ;;  %s795_s6 = smov (!%p243_p9), [#allocation3]  }
  0x15   : > { %644 = vmatpush3.bf16.msra.mxu0 (!%p243_p9), %v715_v2  ;;  %p729_p11 = scmp.ne.s32.totalorder (!%p243_p9), %s929_s30, %s728_s16  ;;  %s732_s17 = sshll.u32 (!%p243_p9), %s795_s6, 4  ;;  %s733_s17 = int_to_ptr.vmem [resolvable:$false] %s732_s17 }
  0x16   : > { %668 = vmatprep.subr.bf16.mxu0 (!%p243_p9), %v794_v28  ;;  %p735_p0 = scmp.lt.s32.totalorder (!%p243_p9), %s929_s30, %s733_s17 }
  0x17   : > { %s984_s18 = smov (!%p274_p10, %s612_s18), 7  ;;  %652 = vmatpush3.bf16.msra.mxu1 %v717_v7  ;;  %p730_p12 = pnand %p729_p11, %p877_p5 }
  0x18   : > { %s613_s19 = sshll.u32 %s984_s18, 3  ;;  %653 = vmatprep.subr.bf16.mxu1 %v792_v1  ;;  %s734_s18 = scalar_lea.vmem %s733_s17, 32 }
  0x19   : > { %s277_s22 = scalar_lea.vmem %s969_s0, %s613_s19  ;;  %p731_p13 = pneg %p730_p12 }
  0x1a   : > { %v280_v3 = vld [vmem:[%s277_s22] sm:$0xff]  ;;  %v281_v4 = vld [vmem:[%s277_s22 + $0x8] sm:$0xff]  ;;  %s457_s22 = sld [smem:[#allocation2]]  ;;  %p736_p1 = scmp.lt.s32.totalorder %s734_s18, %s728_s16 }
  0x1b   : > { %v282_v5 = vpack.c.bf16 %v281_v4, %v280_v3  ;;  %654 = vmatpush3.bf16.msra.mxu1 %v718_v8 }
  0x1c   : > { %655 = vmatprep.subr.bf16.mxu1 %v792_v1  ;;  %p737_p2 = por %p736_p1, %p735_p0 }
  0x1d   : > { %646 = vmatmul.mubr.msk.bf16.vlgmr.msra.gmra.mrb[0].mxu0 %vm306_vm1, %v282_v5 }
  0x1e   : > { %665 = vmatprep.mubr.msk.f32.mxu0 %vm793_vm0, %v792_v1  ;;  %p738_p3 = pnand %p737_p2, %p731_p13 }
  0x1f   : > { %656 = vmatpush3.bf16.msra.mxu1 %v719_v9 }
  0x20   : > { %v458_v48 = vstv %s457_s22 }
  0xf0   : > { %v344_v11 = vpop.f32.mrb[0].mxu0 }
  0xf1   : > { %v345_v12 = vadd.f32 %v614_v10, %v344_v11  ;;  %v647_v13 = vpop.f32.mrb[1].mxu0 }
  0xf2   : > { %v347_v14 = vpop.f32.mrb[2].mxu0 }
  0xf3   : > { %v353_v15 = vmul.f32 0.70710677, %v345_v12  ;;  %v348_v16 = vadd.f32 %v614_v10, %v347_v14  ;;  %v648_v17 = vpop.f32.mrb[3].mxu0  ;;  %v351_v22 = vmul.f32 0.5, %v345_v12 }
  0xf5   : > { %720 = verf.f32 %v353_v15  ;;  %v354_v18 = vmul.f32 0.70710677, %v348_v16  ;;  %v352_v23 = vmul.f32 0.5, %v348_v16 }
  0xf7   : > { %722 = verf.f32 %v354_v18 }
  0xff   : > { %v721_v19 = vpop.eup %720 }
 0x100   : > { %v357_v20 = vadd.f32 1.0, %v721_v19 }
 0x101   : > { %v723_v21 = vpop.eup %722 }
 0x102   : > { %v358_v24 = vadd.f32 1.0, %v723_v21  ;;  %v359_v25 = vmul.f32 %v357_v20, %v351_v22 }
 0x104   : > { %v360_v26 = vmul.f32 %v358_v24, %v352_v23 }
 0x106   : > { %v361_v27 = vpack.c.bf16 %v360_v26, %v359_v25 }
 0x108   : > { %658 = vmatmul.mubr.msk.bf16.vlgmr.msra.gmra.mrb[0].mxu1 %vm401_vm2, %v361_v27 }
 0x1db   : > { %v439_v30 = vpop.f32.mrb[0].mxu1 }
 0x1dc   : > { %v440_v31 = vadd.f32 %v618_v29, %v439_v30  ;;  %v659_v32 = vpop.f32.mrb[1].mxu1 }
 0x1dd   : > { %v442_v33 = vpop.f32.mrb[2].mxu1 }
 0x1de   : > { %v448_v34 = vmul.f32 0.70710677, %v440_v31  ;;  %v443_v35 = vadd.f32 %v618_v29, %v442_v33  ;;  %v660_v36 = vpop.f32.mrb[3].mxu1  ;;  %v446_v41 = vmul.f32 0.5, %v440_v31 }
 0x1e0   : > { %724 = verf.f32 %v448_v34  ;;  %v449_v37 = vmul.f32 0.70710677, %v443_v35  ;;  %v447_v42 = vmul.f32 0.5, %v443_v35 }
 0x1e2   : > { %726 = verf.f32 %v449_v37 }
 0x1ea   : > { %v725_v38 = vpop.eup %724 }
 0x1eb   : > { %v452_v39 = vadd.f32 1.0, %v725_v38 }
 0x1ec   : > { %v727_v40 = vpop.eup %726 }
 0x1ed   : > { %v453_v43 = vadd.f32 1.0, %v727_v40  ;;  %v454_v44 = vmul.f32 %v452_v39, %v446_v41 }
 0x1ef   : > { %v455_v45 = vmul.f32 %v453_v43, %v447_v42 }
 0x1f1   : > { %v669_v46 = vpack.c.bf16 %v455_v45, %v454_v44 }
 0x1f3   : > { %671 = vmatpush3.bf16.xpose.msk.msra.mxu0 %vm670_vm3, %v669_v46 }
 0x1fa   : > { %666 = vmatmul.mubr.msk.f32.vlgmr.msra.gmra.mrb[4].mxu0 %vm306_vm1, %v456_v47 }
 0x2cd   : > { %v534_v49 = vpop.f32.mrb[4].mxu0 }
 0x2ce   : > { %v535_v50 = vadd.f32 %v534_v49, %v458_v48  ;;  %v667_v51 = vpop.f32.mrb[5].mxu0 }
 0x2d0   : > { %539 = vst.msk [vmem:[%s272_s25] sm:$0x1] %vm538_vm4, %v535_v50 }
 0x2d1   : > { %741 = shalt.err (!%p738_p3)
}
 0x2d2   : > { %s742_s19 = scalar_lea.hbm %s927_s14, 16  ;;  %s746_s22 = scalar_lea.hbm %s976_s7, 64 }
 0x2d3   : > { %p743_p4 = scmp.ne.s32.totalorder %s927_s14, %s742_s19  ;;  %p747_p9 = scmp.lt.u32.totalorder %s927_s14, %s976_s7 }
 0x2d4   : > { %p748_p10 = scmp.lt.u32.totalorder %s746_s22, %s742_s19  ;;  %p750_p12 = scmp.lt.u32.totalorder %s742_s19, %s927_s14 }
 0x2d5   : > { %p744_p7 = pnand %p743_p4, %p877_p5 }
 0x2d6   : > { %p749_p11 = por %p748_p10, %p747_p9 }
 0x2d7   : > { %p745_p8 = pneg %p744_p7 }
 0x2d8   : > { %p751_p13 = por %p750_p12, %p749_p11 }
 0x2da   : > { %p752_p0 = pnand %p751_p13, %p745_p8 }
 0x2dc   : > { %755 = shalt.err (!%p752_p0)
}
 0x2dd   : > { %672 = dma.vmem_to_hbm [thread:$0]  (%p877_p5), %s929_s30, 16, %s927_s14, %s541_s15  }
 0x2de PF: > { %p678_p1 = scmp.ge.s32.totalorder %s790_s29, 2  ;;  %s565_s25 = sand.u32 1, %s778_s26  }
 0x2df   : > { %s566_s9 = scalar_lea.sflag [#allocation4], %s565_s25 }
 0x2e0   : > { %p675_p2 = pnand %p678_p1, %p881_p6 }
 0x2e2   : > { %773 = dma.done.wait (!%p675_p2), %s566_s9, 16  }
 0x2e3   : > { %775 = vsyncadd (!%p675_p2), %s566_s9, 4294967280  ;;  %p18_p3 = scmp.ge.s32.totalorder %s864_s8, 6   ;;  %s979_s26 = smov %s782_s27 }
 0x2e4   : > { %s980_s27 = smov %s786_s28  ;;  %s981_s28 = smov %s875_s11 }
 0x2e5   : > { %s982_s29 = smov %s864_s8  ;;  %20 = sbr.rel (!%p18_p3) target bundleno = 5 (0x5), region = 83 }
 0x2ec   :  { %570 = vsyncpa [#allocation4], 1 }
 0x2ed   :  { %572 = vsyncpa [#allocation4 + $0x1], 1 }

</bundles_post_ra>
